<compile_context>
chip_gen: v5e
topology: v5e:2x2
jax: 0.10.0
libtpu: 0.0.40
codegen_flags: <defaults>
</compile_context>

<pallas_src>
import math

import jax
import jax.numpy as jnp
from jax.experimental import pallas as pl
from jax.experimental.pallas import tpu as pltpu

_INV_SQRT2 = 1.0 / math.sqrt(2.0)


def _round_up(x: int, m: int) -> int:
    return (x + m - 1) // m * m


def _gelu_exact(x):
    # Exact (erf-based) GELU == torch.nn.functional.gelu default.
    return 0.5 * x * (1.0 + jax.lax.erf(x * _INV_SQRT2))


# --------------------------------------------------------------------------- #
# Kernels
# --------------------------------------------------------------------------- #
def _ffn_kernel_single(x_ref, w1_ref, b1_ref, w2_ref, b2_ref, o_ref):
    """Hidden dim fully VMEM-resident: fused fc1 -> GELU -> fc2 per row tile."""
    x = x_ref[...].astype(w1_ref.dtype)            # in-kernel cast, no HBM copy
    h = jnp.dot(x, w1_ref[...], preferred_element_type=jnp.float32)
    h = _gelu_exact(h + b1_ref[...])
    y = jnp.dot(h.astype(w2_ref.dtype), w2_ref[...],
                preferred_element_type=jnp.float32)
    o_ref[...] = (y + b2_ref[...]).astype(o_ref.dtype)


def _ffn_kernel_hblock_f32(x_ref, w1_ref, b1_ref, w2_ref, b2_ref, o_ref):
    """Hidden dim blocked on grid axis 1; the resident f32 output block is the
    accumulator, initialized with the fc2 bias at the first hidden block."""
    @pl.when(pl.program_id(1) == 0)
    def _():
        o_ref[...] = jnp.broadcast_to(b2_ref[...], o_ref.shape)

    x = x_ref[...].astype(w1_ref.dtype)
    h = jnp.dot(x, w1_ref[...], preferred_element_type=jnp.float32)
    h = _gelu_exact(h + b1_ref[...])
    o_ref[...] += jnp.dot(h.astype(w2_ref.dtype), w2_ref[...],
                          preferred_element_type=jnp.float32)


def _ffn_kernel_hblock_acc(x_ref, w1_ref, b1_ref, w2_ref, b2_ref, o_ref,
                           acc_ref):
    """Hidden dim blocked; narrow output dtype -> dedicated f32 accumulator."""
    k = pl.program_id(1)

    @pl.when(k == 0)
    def _():
        acc_ref[...] = jnp.broadcast_to(b2_ref[...], acc_ref.shape)

    x = x_ref[...].astype(w1_ref.dtype)
    h = jnp.dot(x, w1_ref[...], preferred_element_type=jnp.float32)
    h = _gelu_exact(h + b1_ref[...])
    acc_ref[...] += jnp.dot(h.astype(w2_ref.dtype), w2_ref[...],
                            preferred_element_type=jnp.float32)

    @pl.when(k == pl.num_programs(1) - 1)
    def _():
        o_ref[...] = acc_ref[...].astype(o_ref.dtype)


# --------------------------------------------------------------------------- #
# Hardware / feature probes
# --------------------------------------------------------------------------- #
def _vmem_limit_bytes() -> int:
    cap = 64 * 1024 * 1024                     # conservative default (v7x TC)
    try:
        info = pltpu.get_tpu_info()
        cap = int(getattr(info, "vmem_capacity_bytes", cap) or cap)
    except Exception:
        pass                                   # not queryable: keep conservative
    # ~81% of physical VMEM: ~104 MiB on 128 MiB parts (v5e/v6e), ~52 MiB on
    # 64 MiB parts (v7x) -- leaves headroom for Mosaic internal scratch.
    return (cap * 13) // 16


def _single_buffer_supported() -> bool:
    try:
        pl.BlockSpec((8, 128), lambda i: (0, 0), pipeline_mode=pl.Buffered(1))
        return True
    except (AttributeError, TypeError, ValueError):
        return False


_SINGLE_BUFFER_OK = _single_buffer_supported()
_FALLBACK_ERRORS = (TypeError, ValueError, NotImplementedError,
                    getattr(pltpu, "LoweringException", NotImplementedError))


# --------------------------------------------------------------------------- #
# Tiling
# --------------------------------------------------------------------------- #
def _hidden_tile_options(Hp: int):
    """Lane-aligned hidden tiles that divide Hp exactly (no padded columns)."""
    n = Hp // 128
    return [128 * d for d in range(1, n + 1) if n % d == 0]


def _select_tiles(R, E, H, x_itemsize, itm_c, itm_o, sub, row_tile, h_tile,
                  budget, out_is_f32, single_buffer):
    """Returns (Ep, Hp, tr, th) fitting the VMEM budget."""
    Ep = _round_up(E, 128)
    Hp = _round_up(H, 128)
    itm_x = max(itm_c, x_itemsize)             # x tile may stay in its own dtype

    def fits(tr, th, n_wbuf, with_acc):
        need = (2 * tr * Ep * itm_x                   # x row tiles (double-buf)
                + 2 * tr * Ep * itm_o                 # output row tiles
                + (tr * Ep * 4 if with_acc else 0)    # f32 accumulator scratch
                + 2 * tr * th * 4                     # fc1/GELU f32 temporaries
                + n_wbuf * 2 * Ep * th * itm_c        # w1 + w2 blocks
                + n_wbuf * th * 4 + 2 * Ep * 4)       # bias blocks (f32)
        return need <= budget

    r_cap = _round_up(R, sub)
    if row_tile is not None:
        tr_cands = [min(_round_up(max(int(row_tile), sub), sub), r_cap)]
    else:
        tr_cands = sorted(
            {min(r_cap, c)
             for c in (1024, 768, 512, 384, 256, 128, 64, 32, 16, 8)
             if c >= sub},
            reverse=True)

    th_all = _hidden_tile_options(Hp)
    if h_tile is not None:
        cap = max(_round_up(int(h_tile), 128), 128)
        th_opts = [t for t in th_all if t <= cap] or [th_all[0]]
    else:
        th_opts = th_all

    # 1) Weights fully VMEM-resident: they DMA exactly once for the whole call.
    if th_opts[-1] == Hp:
        n_wbuf = 1 if single_buffer else 2
        for tr in tr_cands:
            if fits(tr, Hp, n_wbuf, with_acc=False):
                return Ep, Hp, tr, Hp

    # 2) Stream the hidden dim: maximize the row tile first (arithmetic
    #    intensity per streamed weight byte ~ tr), then the hidden tile.
    with_acc = not out_is_f32
    for tr in tr_cands:
        for th in reversed(th_opts):
            if fits(tr, th, 2, with_acc):
                return Ep, Hp, tr, th

    # 3) Last resort: smallest tiles; let the compiler have the final word.
    return Ep, Hp, tr_cands[-1], th_opts[0]


# --------------------------------------------------------------------------- #
# Wrapper
# --------------------------------------------------------------------------- #
def pointwise_ffn(x, w1, b1, w2, b2, *, row_tile=None, h_tile=None,
                  compute_dtype=None):
    """out = fc2(gelu(fc1(x))).

    x: (B, S, E); w1: (E, H); b1: (H,); w2: (H, E); b2: (E,).  Weights are
    stored (in, out): the kernel computes x @ W, equivalent to PyTorch's
    x @ W.T with nn.Linear's (out, in) storage.

    compute_dtype: dtype of the MXU operands.  Defaults to bfloat16 for f32
    inputs (f32 accumulation / bias / GELU are kept); pass jnp.float32 for
    an exact-f32 matmul path.  row_tile / h_tile override the auto tiling.
    """
    B, S, E = x.shape
    H = w1.shape[1]
    out_dtype = jnp.dtype(x.dtype)
    if compute_dtype is None:
        cdt = jnp.dtype(jnp.bfloat16) if out_dtype == jnp.float32 else out_dtype
    else:
        cdt = jnp.dtype(compute_dtype)
    itm_c, itm_o = cdt.itemsize, out_dtype.itemsize
    out_is_f32 = out_dtype == jnp.float32
    sub = max(8, 32 // itm_c, 32 // itm_o)      # sublane multiple (bf16 -> 16)

    R = B * S
    vmem_limit = _vmem_limit_bytes()
    budget = (vmem_limit * 9) // 10             # headroom within our own limit

    def _forward(single_buffer):
        Ep, Hp, tr, th = _select_tiles(
            R, E, H, jnp.dtype(x.dtype).itemsize, itm_c, itm_o, sub,
            row_tile, h_tile, budget, out_is_f32, single_buffer)
        # Feed both TensorCores on 2-TC parts: keep >= 2 row tiles when cheap.
        if row_tile is None and R <= tr and tr >= 128:
            tr = _round_up((tr + 1) // 2, sub)
        Rp = _round_up(R, tr)
        num_r, num_h = Rp // tr, Hp // th

        # ---- operand prep: pad / cast only when a copy is actually required -
        x2 = x.reshape(R, E)
        if Rp != R or Ep != E:
            # A copy is unavoidable: fold the compute-dtype cast into it.
            x2 = jnp.pad(x2.astype(cdt), ((0, Rp - R), (0, Ep - E)))
        # else: x goes in untouched; the kernel casts the VMEM tile.
        w1p, w2p = w1.astype(cdt), w2.astype(cdt)
        if Ep != E or Hp != H:
            w1p = jnp.pad(w1p, ((0, Ep - E), (0, Hp - H)))
            w2p = jnp.pad(w2p, ((0, Hp - H), (0, Ep - E)))
        b1p = jnp.pad(b1.astype(jnp.float32), (0, Hp - H)).reshape(1, Hp)
        b2p = jnp.pad(b2.astype(jnp.float32), (0, Ep - E)).reshape(1, Ep)

        w_bytes = 2 * Ep * Hp * itm_c + (Hp + Ep) * 4
        cost = pl.CostEstimate(
            flops=4 * Rp * Ep * Hp,             # two matmuls, 2 flops per MAC
            transcendentals=Rp * Hp,            # one erf per hidden element
            bytes_accessed=int(x2.size * x2.dtype.itemsize
                               + (1 if num_h == 1 else num_r) * w_bytes
                               + Rp * Ep * itm_o),
        )

        wmode = {"pipeline_mode": pl.Buffered(1)} if single_buffer else {}

        if num_h == 1:
            grid = (num_r,)
            in_specs = [
                pl.BlockSpec((tr, Ep), lambda i: (i, 0)),
                pl.BlockSpec((Ep, Hp), lambda i: (0, 0), **wmode),
                pl.BlockSpec((1, Hp), lambda i: (0, 0), **wmode),
                pl.BlockSpec((Hp, Ep), lambda i: (0, 0), **wmode),
                pl.BlockSpec((1, Ep), lambda i: (0, 0), **wmode),
            ]
            out_specs = pl.BlockSpec((tr, Ep), lambda i: (i, 0))
            kernel, scratch = _ffn_kernel_single, []
            dims = ("parallel",)
        else:
            grid = (num_r, num_h)
            in_specs = [
                pl.BlockSpec((tr, Ep), lambda i, k: (i, 0)),
                pl.BlockSpec((Ep, th), lambda i, k: (0, k)),
                pl.BlockSpec((1, th), lambda i, k: (0, k)),
                pl.BlockSpec((th, Ep), lambda i, k: (k, 0)),
                pl.BlockSpec((1, Ep), lambda i, k: (0, 0), **wmode),
            ]
            out_specs = pl.BlockSpec((tr, Ep), lambda i, k: (i, 0))
            if out_is_f32:
                kernel, scratch = _ffn_kernel_hblock_f32, []
            else:
                kernel, scratch = (_ffn_kernel_hblock_acc,
                                   [pltpu.VMEM((tr, Ep), jnp.float32)])
            dims = ("parallel", "arbitrary")

        out = pl.pallas_call(
            kernel,
            out_shape=jax.ShapeDtypeStruct((Rp, Ep), out_dtype),
            grid_spec=pltpu.PrefetchScalarGridSpec(
                num_scalar_prefetch=0, grid=grid, in_specs=in_specs,
                out_specs=out_specs, scratch_shapes=scratch),
            compiler_params=pltpu.CompilerParams(
                dimension_semantics=dims, vmem_limit_bytes=int(vmem_limit)),
            cost_estimate=cost,
        )(x2, w1p, b1p, w2p, b2p)

        if Rp != R or Ep != E:
            out = out[:R, :E]
        return out.reshape(B, S, E)

    if _SINGLE_BUFFER_OK:
        try:
            return _forward(True)
        except _FALLBACK_ERRORS:
            # pl.Buffered(1) accepted by the constructor but rejected further
            # down on this build: re-derive tiles for default double buffering.
            pass
    return _forward(False)


# --------------------------------------------------------------------------- #
# Reference + self-test
# --------------------------------------------------------------------------- #
def _ref_ffn(x, w1, b1, w2, b2):
    h = jnp.dot(x, w1) + b1
    h = 0.5 * h * (1.0 + jax.lax.erf(h * _INV_SQRT2))
    return jnp.dot(h, w2) + b2


def _init_linear(key, fan_in, fan_out):
    # Mimics nn.Linear's uniform(-1/sqrt(fan_in), 1/sqrt(fan_in)) init,
    # stored as (in, out).
    kw, kb = jax.random.split(key)
    lim = 1.0 / math.sqrt(fan_in)
    w = jax.random.uniform(kw, (fan_in, fan_out), minval=-lim, maxval=lim,
                           dtype=jnp.float32)
    b = jax.random.uniform(kb, (fan_out,), minval=-lim, maxval=lim,
                           dtype=jnp.float32)
    return w, b


if __name__ == "__main__":
    key = jax.random.PRNGKey(0)
    kx, k1, k2, kx2, kx3, k3, k4 = jax.random.split(key, 7)

    # 1) default path (bf16 MXU operands, f32 accumulation / bias / GELU).
    batch, seq, embed, hidden = 2, 8, 32, 64
    x = jax.random.normal(kx, (batch, seq, embed), dtype=jnp.float32)
    w1, b1 = _init_linear(k1, embed, hidden)
    w2, b2 = _init_linear(k2, hidden, embed)
    ref = _ref_ffn(x, w1, b1, w2, b2)

    out = jax.block_until_ready(pointwise_ffn(x, w1, b1, w2, b2))
    assert out.shape == (batch, seq, embed)
    assert jnp.allclose(out, ref, atol=2e-2, rtol=2e-2), "bf16-default mismatch"

    # 2) exact f32 compute path (matches the PyTorch module's f32 forward).
    out_f32 = jax.block_until_ready(
        pointwise_ffn(x, w1, b1, w2, b2, compute_dtype=jnp.float32))
    assert jnp.allclose(out_f32, ref, atol=1e-5, rtol=1e-5), "f32 mismatch"

    # 3) ragged rows + blocked hidden dim (f32 output accumulates in o_ref).
    b3, s3, e3, h3 = 3, 5, 32, 192
    x3 = jax.random.normal(kx2, (b3, s3, e3), dtype=jnp.float32)
    w13, b13 = _init_linear(k3, e3, h3)
    w23, b23 = _init_linear(k4, h3, e3)
    out3 = jax.block_until_ready(
        pointwise_ffn(x3, w13, b13, w23, b23, row_tile=8, h_tile=128))
    ref3 = _ref_ffn(x3, w13, b13, w23, b23)
    assert out3.shape == (b3, s3, e3)
    assert jnp.allclose(out3, ref3, atol=2e-2, rtol=2e-2), "H-blocked mismatch"

    # 4) bf16 activations + blocked hidden dim (f32 scratch accumulator path).
    x4 = x3.astype(jnp.bfloat16)
    out4 = jax.block_until_ready(
        pointwise_ffn(x4, w13, b13, w23, b23, h_tile=128))
    ref4 = _ref_ffn(x4.astype(jnp.float32), w13, b13, w23, b23)
    assert out4.dtype == jnp.bfloat16 and out4.shape == (b3, s3, e3)
    assert jnp.allclose(out4.astype(jnp.float32), ref4, atol=3e-2, rtol=3e-2), \
        "bf16-output mismatch"

    # 5) lane-aligned shapes: x enters the kernel untouched (in-kernel cast).
    b5, s5, e5, h5 = 2, 64, 128, 256
    x5 = jax.random.normal(kx3, (b5, s5, e5), dtype=jnp.float32)
    w15, b15 = _init_linear(k1, e5, h5)
    w25, b25 = _init_linear(k2, h5, e5)
    out5 = jax.block_until_ready(pointwise_ffn(x5, w15, b15, w25, b25))
    ref5 = _ref_ffn(x5, w15, b15, w25, b25)
    assert out5.shape == (b5, s5, e5)
    assert jnp.allclose(out5, ref5, atol=3e-2, rtol=3e-2), "aligned-path mismatch"

    print("KERNEL_OK")
</pallas_src>

<mosaic_0001>
module attributes {stable_mosaic.version = 11 : i64} {
  func.func @_ffn_kernel_single(%arg0: i32, %arg1: memref<16x128xbf16, #tpu.memory_space<vmem>>, %arg2: memref<128x128xbf16, #tpu.memory_space<vmem>>, %arg3: memref<1x128xf32, #tpu.memory_space<vmem>>, %arg4: memref<128x128xbf16, #tpu.memory_space<vmem>>, %arg5: memref<1x128xf32, #tpu.memory_space<vmem>>, %arg6: memref<16x128xf32, #tpu.memory_space<vmem>>) attributes {dimension_semantics = [#tpu.dimension_semantics<parallel>], iteration_bounds = array<i64: 1>, scalar_prefetch = 0 : i64, scratch_operands = 0 : i64, tpu.core_type = #tpu.core_type<tc>, window_params = [{transform_indices = @transform_0, window_bounds = array<i64: 16, 128>}, {pipeline_mode = #tpu.pipeline_mode<synchronous>, transform_indices = @transform_1, window_bounds = array<i64: 128, 128>}, {pipeline_mode = #tpu.pipeline_mode<synchronous>, transform_indices = @transform_2, window_bounds = array<i64: 1, 128>}, {pipeline_mode = #tpu.pipeline_mode<synchronous>, transform_indices = @transform_3, window_bounds = array<i64: 128, 128>}, {pipeline_mode = #tpu.pipeline_mode<synchronous>, transform_indices = @transform_4, window_bounds = array<i64: 1, 128>}, {transform_indices = @transform_5, window_bounds = array<i64: 16, 128>}]} {
    %c0 = arith.constant 0 : index
    %c0_0 = arith.constant 0 : index
    %0 = vector.load %arg1[%c0, %c0_0] : memref<16x128xbf16, #tpu.memory_space<vmem>>, vector<16x128xbf16>
    %c0_1 = arith.constant 0 : index
    %c0_2 = arith.constant 0 : index
    %1 = vector.load %arg2[%c0_1, %c0_2] : memref<128x128xbf16, #tpu.memory_space<vmem>>, vector<128x128xbf16>
    %cst = arith.constant dense<0.000000e+00> : vector<16x128xf32>
    %2 = tpu.matmul %0, %1, %cst {dimension_numbers = #tpu.dot_dimension_numbers<[1], [0], [0], [1], [0, 0, 1, 1], [], []>} : vector<16x128xbf16>, vector<128x128xbf16>, vector<16x128xf32> -> vector<16x128xf32>
    %c0_3 = arith.constant 0 : index
    %c0_4 = arith.constant 0 : index
    %3 = vector.load %arg3[%c0_3, %c0_4] : memref<1x128xf32, #tpu.memory_space<vmem>>, vector<1x128xf32>
    %4 = vector.broadcast %3 : vector<1x128xf32> to vector<16x128xf32>
    %5 = arith.addf %2, %4 : vector<16x128xf32>
    %cst_5 = arith.constant 5.000000e-01 : f32
    %6 = vector.broadcast %cst_5 : f32 to vector<16x128xf32>
    %7 = arith.mulf %6, %5 : vector<16x128xf32>
    %cst_6 = arith.constant 0.707106769 : f32
    %8 = vector.broadcast %cst_6 : f32 to vector<16x128xf32>
    %9 = arith.mulf %5, %8 : vector<16x128xf32>
    %10 = math.erf %9 : vector<16x128xf32>
    %cst_7 = arith.constant 1.000000e+00 : f32
    %11 = vector.broadcast %cst_7 : f32 to vector<16x128xf32>
    %12 = arith.addf %11, %10 : vector<16x128xf32>
    %13 = arith.mulf %7, %12 : vector<16x128xf32>
    %14 = arith.truncf %13 : vector<16x128xf32> to vector<16x128xbf16>
    %c0_8 = arith.constant 0 : index
    %c0_9 = arith.constant 0 : index
    %15 = vector.load %arg4[%c0_8, %c0_9] : memref<128x128xbf16, #tpu.memory_space<vmem>>, vector<128x128xbf16>
    %cst_10 = arith.constant dense<0.000000e+00> : vector<16x128xf32>
    %16 = tpu.matmul %14, %15, %cst_10 {dimension_numbers = #tpu.dot_dimension_numbers<[1], [0], [0], [1], [0, 0, 1, 1], [], []>} : vector<16x128xbf16>, vector<128x128xbf16>, vector<16x128xf32> -> vector<16x128xf32>
    %c0_11 = arith.constant 0 : index
    %c0_12 = arith.constant 0 : index
    %17 = vector.load %arg5[%c0_11, %c0_12] : memref<1x128xf32, #tpu.memory_space<vmem>>, vector<1x128xf32>
    %18 = vector.broadcast %17 : vector<1x128xf32> to vector<16x128xf32>
    %19 = arith.addf %16, %18 : vector<16x128xf32>
    %c0_13 = arith.constant 0 : index
    %c0_14 = arith.constant 0 : index
    %20 = vector.load %arg6[%c0_13, %c0_14] : memref<16x128xf32, #tpu.memory_space<vmem>>, vector<16x128xf32>
    tpu.vector_store %arg6[%c0_13, %c0_14], %19 {strides = array<i32>} : memref<16x128xf32, #tpu.memory_space<vmem>>, vector<16x128xf32>,
    return
  }
  func.func @transform_0(%arg0: i32) -> (i32, i32) {
    %c0_i32 = arith.constant 0 : i32
    %c0_i32_0 = arith.constant 0 : i32
    return %arg0, %c0_i32 : i32, i32
  }
  func.func @transform_1(%arg0: i32) -> (i32, i32) {
    %c0_i32 = arith.constant 0 : i32
    %c0_i32_0 = arith.constant 0 : i32
    %c0_i32_1 = arith.constant 0 : i32
    return %c0_i32, %c0_i32_0 : i32, i32
  }
  func.func @transform_2(%arg0: i32) -> (i32, i32) {
    %c0_i32 = arith.constant 0 : i32
    %c0_i32_0 = arith.constant 0 : i32
    %c0_i32_1 = arith.constant 0 : i32
    return %c0_i32, %c0_i32_0 : i32, i32
  }
  func.func @transform_3(%arg0: i32) -> (i32, i32) {
    %c0_i32 = arith.constant 0 : i32
    %c0_i32_0 = arith.constant 0 : i32
    %c0_i32_1 = arith.constant 0 : i32
    return %c0_i32, %c0_i32_0 : i32, i32
  }
  func.func @transform_4(%arg0: i32) -> (i32, i32) {
    %c0_i32 = arith.constant 0 : i32
    %c0_i32_0 = arith.constant 0 : i32
    %c0_i32_1 = arith.constant 0 : i32
    return %c0_i32, %c0_i32_0 : i32, i32
  }
  func.func @transform_5(%arg0: i32) -> (i32, i32) {
    %c0_i32 = arith.constant 0 : i32
    %c0_i32_0 = arith.constant 0 : i32
    return %arg0, %c0_i32 : i32, i32
  }
}

</mosaic_0001>

<bundles_post_ra>
// kernel: tpu_custom_call.1
= control target key start
LH: loop header
LB: loop body
LE: loop exit
PB: predicated region body
PF: predicated region fallthrough
CT: control target
= control target key end

     0   :  { %10 = vsyncpa [#allocation3], 0  ;;  %s628_s0 = inlined_call_operand.hbm [shape: bf16[16,128], index: 0, kind: input, shape index: {}]   ;;  %s629_s1 = inlined_call_operand.hbm [shape: bf16[128,128], index: 1, kind: input, shape index: {}]   ;;  %s630_s2 = inlined_call_operand.vmem [shape: f32[1,128], index: 2, kind: input, shape index: {}]   ;;  %s631_s3 = inlined_call_operand.hbm [shape: bf16[128,128], index: 3, kind: input, shape index: {}]   ;;  %s632_s4 = inlined_call_operand.vmem [shape: f32[1,128], index: 4, kind: input, shape index: {}]   ;;  %s633_s5 = inlined_call_operand.hbm [shape: f32[16,128], index: 5, kind: output, shape index: {}]  }
   0x1   :  { %11 = vsyncpa [#allocation6], 0 }
   0x2   :  { %12 = vsyncpa [#allocation4], 0  ;;  %s30_s20 = sshll.u32 %s629_s1, 4  ;;  %s554_s21 = smov [#allocation5]   ;;  %s31_s20 = int_to_ptr.hbm [resolvable:$true] %s30_s20 }
   0x3   :  { %s32_s22 = sshll.u32 %s554_s21, 4  ;;  %s17_s25 = sshll.u32 %s628_s0, 4  ;;  %s33_s22 = int_to_ptr.vmem [resolvable:$true] %s32_s22  ;;  %s18_s25 = int_to_ptr.hbm [resolvable:$true] %s17_s25 }
   0x4   :  { %s555_s26 = smov 64   ;;  %s556_s27 = smov 4  }
   0x5   :  { %38 = dma.hbm_to_vmem [thread:$0]  %s31_s20, 1024, %s33_s22, [#allocation6], %s555_s26, %s555_s26, %s556_s27  }
   0x6   :  { %s557_s28 = smov [#allocation2]   ;;  %s45_s7 = sshll.u32 %s631_s3, 4  ;;  %s46_s7 = int_to_ptr.hbm [resolvable:$true] %s45_s7 }
   0x7   :  { %s19_s29 = sshll.u32 %s557_s28, 4  ;;  %s558_s1 = smov [#allocation7]   ;;  %s20_s29 = int_to_ptr.vmem [resolvable:$true] %s19_s29 }
   0x8   :  { %25 = dma.hbm_to_vmem [thread:$0]  %s18_s25, 128, %s20_s29, [#allocation3], %s555_s26, %s555_s26, %s556_s27  }
   0x9   :  { %s47_s8 = sshll.u32 %s558_s1, 4  ;;  %s48_s8 = int_to_ptr.vmem [resolvable:$true] %s47_s8 }
   0xa   :  { %53 = dma.hbm_to_vmem [thread:$0]  %s46_s7, 1024, %s48_s8, [#allocation6], %s555_s26, %s555_s26, %s556_s27  }
   0xb   :  { %548 = dma.done.wait [#allocation3], 128  }
   0xc   :  { %549 = vsyncadd [#allocation3], 4294967168 }
   0xd   :  { %550 = dma.done.wait [#allocation6], 2048  }
   0xe   :  { %551 = vsyncadd [#allocation6], 4294965248  ;;  %v429_v0 = vld [vmem:[#allocation5 + $0x38] sm:$0xff]  ;;  %v428_v1 = vld [vmem:[#allocation5 + $0x30] sm:$0xff]  ;;  %s559_s10 = smov [#allocation8]   ;;  %s337_s14 = sshll.u32 %s633_s5, 4  ;;  %s338_s14 = int_to_ptr.hbm [resolvable:$true] %s337_s14 }
   0xf   :  { %144 = vmatpush.bf16.msra.mxu0 %v429_v0  ;;  %v427_v2 = vld [vmem:[#allocation5 + $0x28] sm:$0xff]  ;;  %v426_v3 = vld [vmem:[#allocation5 + $0x20] sm:$0xff]  ;;  %v425_v4 = vld [vmem:[#allocation5 + $0x18] sm:$0xff]  ;;  %s335_s11 = sshll.u32 %s559_s10, 4  ;;  %s560_s15 = smov 128   ;;  %s336_s11 = int_to_ptr.vmem [resolvable:$true] %s335_s11 }
  0x10   :  { %v424_v5 = vld [vmem:[#allocation5 + $0x10] sm:$0xff]  ;;  %v423_v6 = vld [vmem:[#allocation5 + $0x8] sm:$0xff]  ;;  %v422_v7 = vld [vmem:[#allocation5] sm:$0xff]  ;;  %s561_s16 = smov 8  }
  0x11   :  { %v421_v8 = vld [vmem:[#allocation2] sm:$0xff]  ;;  %v436_v14 = vld [vmem:[#allocation7 + $0x30] sm:$0xff]  ;;  %v435_v16 = vld [vmem:[#allocation7 + $0x28] sm:$0xff] }
  0x12   :  { %v446_v9 = vld [vmem:[%s630_s2] ss:$0 sm:$0xff]  ;;  %v434_v21 = vld [vmem:[#allocation7 + $0x20] sm:$0xff]  ;;  %v432_v33 = vld [vmem:[#allocation7 + $0x10] sm:$0xff] }
  0x13   :  { %145 = vmatpush.bf16.msra.mxu0 %v428_v1  ;;  %v437_v10 = vld [vmem:[#allocation7 + $0x38] sm:$0xff]  ;;  %v431_v41 = vld [vmem:[#allocation7 + $0x8] sm:$0xff]  ;;  %v430_v48 = vld [vmem:[#allocation7] sm:$0xff] }
  0x14   :  { %315 = vmatpush.bf16.msra.mxu1 %v437_v10  ;;  %v433_v27 = vld [vmem:[#allocation7 + $0x18] sm:$0xff] }
  0x17   :  { %146 = vmatpush.bf16.msra.mxu0 %v427_v2 }
  0x18   :  { %316 = vmatpush.bf16.msra.mxu1 %v436_v14 }
  0x1b   :  { %147 = vmatpush.bf16.msra.mxu0 %v426_v3 }
  0x1c   :  { %317 = vmatpush.bf16.msra.mxu1 %v435_v16 }
  0x1f   :  { %148 = vmatpush.bf16.msra.mxu0 %v425_v4 }
  0x20   :  { %318 = vmatpush.bf16.msra.mxu1 %v434_v21 }
  0x23   :  { %149 = vmatpush.bf16.msra.mxu0 %v424_v5 }
  0x24   :  { %319 = vmatpush.bf16.msra.mxu1 %v433_v27 }
  0x27   :  { %150 = vmatpush.bf16.msra.mxu0 %v423_v6 }
  0x28   :  { %320 = vmatpush.bf16.msra.mxu1 %v432_v33 }
  0x2b   :  { %151 = vmatpush.bf16.msra.mxu0 %v422_v7 }
  0x2c   :  { %321 = vmatpush.bf16.msra.mxu1 %v431_v41 }
  0x2e   :  { %152 = vmatmul.bf16.vlgmr.msra.gmra.mxu0 %v421_v8 }
  0x30   :  { %322 = vmatpush.bf16.msra.mxu1 %v430_v48 }
  0xab   :  { %v153_v11 = vpop.f32.mrf.mxu0 }
  0xac   :  { %v604_v12 = vadd.f32 %v446_v9, %v153_v11 }
  0xae   :  { %v607_v13 = vmul.f32 0.70710677, %v604_v12 }
  0xb0   :  { %v162_v15 = vmul.f32 %v607_v13, %v607_v13 }
  0xb2   :  { %v163_v17 = vmin.f32 %v162_v15, 16.0 }
  0xb3   :  { %v155_v18 = vpop.f32.mrf.mxu0 }
  0xb4   :  { %v164_v19 = vmul.f32 2.1237322e-06, %v163_v17  ;;  %v611_v20 = vadd.f32 %v446_v9, %v155_v18  ;;  %v175_v22 = vmul.f32 3.8918573e-05, %v163_v17 }
  0xb6   :  { %v165_v23 = vadd.f32 0.00028619796, %v164_v19  ;;  %v614_v24 = vmul.f32 0.70710677, %v611_v20  ;;  %v176_v25 = vadd.f32 0.001143296, %v175_v22 }
  0xb8   :  { %v202_v26 = vmul.f32 %v614_v24, %v614_v24  ;;  %v166_v28 = vmul.f32 %v165_v23, %v163_v17  ;;  %v177_v29 = vmul.f32 %v176_v25, %v163_v17 }
  0xba   :  { %v203_v30 = vmin.f32 %v202_v26, 16.0  ;;  %v178_v31 = vadd.f32 0.014752088, %v177_v29  ;;  %v167_v35 = vadd.f32 0.0036580483, %v166_v28 }
  0xbc   :  { %v204_v32 = vmul.f32 2.1237322e-06, %v203_v30  ;;  %v215_v34 = vmul.f32 3.8918573e-05, %v203_v30  ;;  %v179_v36 = vmul.f32 %v178_v31, %v163_v17  ;;  %v168_v43 = vmul.f32 %v167_v35, %v163_v17 }
  0xbd   :  { %v159_v35 = vmul.f32 0.5, %v611_v20 }
  0xbe   :  { %v205_v37 = vadd.f32 0.00028619796, %v204_v32  ;;  %v216_v38 = vadd.f32 0.001143296, %v215_v34  ;;  %v180_v39 = vadd.f32 0.112945676, %v179_v36 }
  0xbf   :  { %v169_v50 = vadd.f32 0.05243302, %v168_v43  ;;  %v158_v34 = vmul.f32 0.5, %v604_v12 }
  0xc0   :  { %v206_v40 = vmul.f32 %v205_v37, %v203_v30  ;;  %v217_v42 = vmul.f32 %v216_v38, %v203_v30  ;;  %v181_v44 = vmul.f32 %v180_v39, %v163_v17 }
  0xc1   :  { %v170_v56 = vmul.f32 %v169_v50, %v163_v17 }
  0xc2   :  { %v207_v45 = vadd.f32 0.0036580483, %v206_v40  ;;  %v218_v46 = vadd.f32 0.014752088, %v217_v42  ;;  %v182_v47 = vadd.f32 0.4994258, %v181_v44 }
  0xc3   :  { %v171_v60 = vadd.f32 0.18741608, %v170_v56 }
  0xc4   :  { %v219_v49 = vmul.f32 %v218_v46, %v203_v30  ;;  %v183_v51 = vmul.f32 %v182_v47, %v163_v17  ;;  %v208_v52 = vmul.f32 %v207_v45, %v203_v30 }
  0xc5   :  { %v172_v1 = vmul.f32 %v171_v60, %v163_v17 }
  0xc6   :  { %v220_v53 = vadd.f32 0.112945676, %v219_v49  ;;  %v184_v54 = vadd.f32 1.0, %v183_v51  ;;  %v209_v57 = vadd.f32 0.05243302, %v208_v52 }
  0xc7   :  { %v173_v7 = vadd.f32 1.1283791, %v172_v1 }
  0xc8   :  { %v221_v55 = vmul.f32 %v220_v53, %v203_v30  ;;  %448 = vrcp.f32 %v184_v54  ;;  %v210_v61 = vmul.f32 %v209_v57, %v203_v30  ;;  %v196_v4 = vand.u32 2147483648, %v184_v54 }
  0xc9   :  { %v194_v6 = vand.u32 2147483647, %v184_v54  ;;  %vm190_vm1 = vweird.f32 %v184_v54  ;;  %v174_v16 = vmul.f32 %v173_v7, %v607_v13 }
  0xca   :  { %v222_v58 = vadd.f32 0.4994258, %v221_v55  ;;  %v211_v2 = vadd.f32 0.18741608, %v210_v61  ;;  %v197_v11 = vor.u32 1.1754944e-38, %v196_v4 }
  0xcb   :  { %vm195_vm3 = vcmp.eq.f32.partialorder %v194_v6, 8.507059e+37 }
  0xcc   :  { %v223_v59 = vmul.f32 %v222_v58, %v203_v30  ;;  %v212_v9 = vmul.f32 %v211_v2, %v203_v30 }
  0xce   :  { %v224_v62 = vadd.f32 1.0, %v223_v59  ;;  %v449_v63 = vpop.eup %448  ;;  %v213_v19 = vadd.f32 1.1283791, %v212_v9 }
  0xcf   :  { %v186_v0 = vmul.f32 %v449_v63, %v184_v54  ;;  %vm191_vm0 = vweird.f32 %v449_v63 }
  0xd0   :  { %450 = vrcp.f32 %v224_v62  ;;  %vm192_vm2 = vmor %vm190_vm1, %vm191_vm0  ;;  %v236_v21 = vand.u32 2147483648, %v224_v62  ;;  %v234_v25 = vand.u32 2147483647, %v224_v62  ;;  %vm230_vm5 = vweird.f32 %v224_v62 }
  0xd1   :  { %v187_v3 = vsub.f32 1.0, %v186_v0  ;;  %v214_v28 = vmul.f32 %v213_v19, %v614_v24  ;;  %v447_v24 = vld [vmem:[%s632_s4] ss:$0 sm:$0xff] }
  0xd2   :  { %v237_v27 = vor.u32 1.1754944e-38, %v236_v21  ;;  %vm235_vm7 = vcmp.eq.f32.partialorder %v234_v25, 8.507059e+37 }
  0xd3   :  { %v188_v5 = vmul.f32 %v449_v63, %v187_v3 }
  0xd5   :  { %v189_v10 = vadd.f32 %v449_v63, %v188_v5 }
  0xd6   :  { %v451_v8 = vpop.eup %450 }
  0xd7   :  { %v226_v14 = vmul.f32 %v451_v8, %v224_v62  ;;  %v193_v15 = vsel %vm192_vm2, %v449_v63, %v189_v10  ;;  %vm231_vm4 = vweird.f32 %v451_v8 }
  0xd8   :  { %v198_v18 = vsel %vm195_vm3, %v197_v11, %v193_v15  ;;  %vm232_vm6 = vmor %vm230_vm5, %vm231_vm4 }
  0xd9   :  { %v227_v17 = vsub.f32 1.0, %v226_v14  ;;  %v199_v22 = vmul.f32 %v198_v18, %v174_v16 }
  0xdb   :  { %v228_v23 = vmul.f32 %v451_v8, %v227_v17  ;;  %v387_v29 = vclamps-f32 %v199_v22, 1.0 }
  0xdd   :  { %v229_v26 = vadd.f32 %v451_v8, %v228_v23  ;;  %v242_v33 = vadd.f32 1.0, %v387_v29 }
  0xdf   :  { %v233_v30 = vsel %vm232_vm6, %v451_v8, %v229_v26  ;;  %v244_v37 = vmul.f32 %v242_v33, %v158_v34 }
  0xe0   :  { %v238_v31 = vsel %vm235_vm7, %v237_v27, %v233_v30 }
  0xe1   :  { %v239_v32 = vmul.f32 %v238_v31, %v214_v28 }
  0xe3   :  { %v388_v13 = vclamps-f32 %v239_v32, 1.0 }
  0xe5   :  { %v243_v36 = vadd.f32 1.0, %v388_v13 }
  0xe7   :  { %v245_v38 = vmul.f32 %v243_v36, %v159_v35 }
  0xe9   :  { %v246_v39 = vpack.c.bf16 %v245_v38, %v244_v37 }
  0xeb   :  { %323 = vmatmul.bf16.vlgmr.msra.gmra.mxu1 %v246_v39 }
 0x168   :  { %v324_v40 = vpop.f32.mrf.mxu1 }
 0x169   :  { %v325_v41 = vadd.f32 %v447_v24, %v324_v40 }
 0x16b   :  { %329 = vst [vmem:[#allocation8] sm:$0xff] %v325_v41 }
 0x170   :  { %v326_v12 = vpop.f32.mrf.mxu1 }
 0x171   :  { %v327_v20 = vadd.f32 %v447_v24, %v326_v12 }
 0x173   :  { %330 = vst [vmem:[#allocation8 + $0x8] sm:$0xff] %v327_v20 }
 0x174   :  { %343 = dma.vmem_to_hbm [thread:$0]  %s336_s11, 256, %s338_s14, [#allocation4], %s560_s15, %s560_s15, %s561_s16  }
 0x175   :  { %552 = dma.done.wait [#allocation4], 256  }
 0x176   :  { %553 = vsyncadd [#allocation4], 4294967040 }
 0x177   :  { %348 = vsyncpa [#allocation3], 1 }
 0x178   :  { %349 = vsyncpa [#allocation6], 1 }
 0x179   :  { %350 = vsyncpa [#allocation4], 1 }

</bundles_post_ra>
